<compile_context>
chip_gen: v7x
topology: tpu7x:2x2x1
jax: 0.10.0
libtpu: 0.0.40
codegen_flags: <defaults>
</compile_context>

<pallas_src>
import math

import jax
import jax.numpy as jnp
from jax.experimental import pallas as pl
from jax.experimental.pallas import tpu as pltpu


HIDDEN1 = 128
HIDDEN2 = 32   # in/out features of the noisy layers (fixed by the module)


# ---------------------------------------------------------------------------
# Kernel: one batch tile of the full NoisyDQN forward.
# ---------------------------------------------------------------------------
def noisy_dqn_kernel(x_ref, w1_ref, b1_ref, w2_ref, b2_ref, w34_ref, b34_ref,
                     out_ref):
    # dense 1: num_inputs -> 128 (bf16 MXU operands, f32 accumulate).
    # x is cast to bf16 here (in VMEM) rather than in the wrapper.
    h1 = jnp.dot(x_ref[...].astype(jnp.bfloat16), w1_ref[...],
                 preferred_element_type=jnp.float32)
    h1 = jnp.maximum(h1 + b1_ref[...], 0.0)

    # dense 2: 128 -> 32
    h2 = jnp.dot(h1.astype(jnp.bfloat16), w2_ref[...],
                 preferred_element_type=jnp.float32)
    h2 = jnp.maximum(h2 + b2_ref[...], 0.0)

    # fused noisy1+noisy2 (W34/b34 pre-fused once outside the kernel):
    # out = h2 @ W34 + b34
    out = jnp.dot(h2.astype(jnp.bfloat16), w34_ref[...],
                  preferred_element_type=jnp.float32)
    out_ref[...] = out + b34_ref[...]


# ---------------------------------------------------------------------------
# Tiling / wrapper.
# ---------------------------------------------------------------------------
def _round_up(v, m):
    return ((v + m - 1) // m) * m


def _choose_batch_tile(batch, num_inputs, num_actions, x_itemsize,
                       vmem_limit_bytes=32 * 1024 * 1024):
    """Pick the batch tile: as large as the VMEM budget allows (safe against
    v7x's 64 MiB physical VMEM), but never a single tile for batch > 8 so the
    'parallel' batch axis can shard across both v7x TensorCores."""
    if batch <= 8:
        return int(batch)            # single whole-array tile (full-dim block)

    # VMEM bytes per batch row: double-buffered x tile (caller dtype) +
    # double-buffered f32 out tile + f32 h1/h2 temporaries (+ bf16 MXU copies).
    per_row = (2 * num_inputs * x_itemsize
               + 2 * num_actions * 4
               + HIDDEN1 * (4 + 2)
               + HIDDEN2 * (4 + 2))
    budget = int(0.6 * vmem_limit_bytes)   # headroom for resident weights etc.
    tb_cap = max(8, min(8192, (budget // per_row) // 8 * 8))

    # At least two grid tiles (megacore on v7x); amortizes fine since tiles
    # stay >= 8 rows.
    tb_half = _round_up(pl.cdiv(batch, 2), 8)
    return int(min(tb_cap, tb_half))


def noisy_dqn_forward(x, fused):
    """x: [B, num_inputs] (f32 or bf16). Returns [B, num_actions] float32."""
    B, num_inputs = x.shape
    num_actions = fused["w34"].shape[1]

    tb = _choose_batch_tile(B, num_inputs, num_actions, x.dtype.itemsize)
    grid = (pl.cdiv(B, tb),)                 # ragged last tile handled by Pallas
    const2 = lambda i: (0, 0)                # resident weights: single DMA each

    out = pl.pallas_call(
        noisy_dqn_kernel,
        out_shape=jax.ShapeDtypeStruct((B, num_actions), jnp.float32),
        grid_spec=pltpu.PrefetchScalarGridSpec(
            num_scalar_prefetch=0,
            grid=grid,
            in_specs=[
                pl.BlockSpec((tb, num_inputs), lambda i: (i, 0)),  # streamed x
                pl.BlockSpec(fused["w1"].shape, const2),
                pl.BlockSpec(fused["b1"].shape, const2),
                pl.BlockSpec(fused["w2"].shape, const2),
                pl.BlockSpec(fused["b2"].shape, const2),
                pl.BlockSpec(fused["w34"].shape, const2),
                pl.BlockSpec(fused["b34"].shape, const2),
            ],
            out_specs=pl.BlockSpec((tb, num_actions), lambda i: (i, 0)),
        ),
        compiler_params=pltpu.CompilerParams(
            dimension_semantics=("parallel",),      # megacore split on v7x
            vmem_limit_bytes=32 * 1024 * 1024,
        ),
    )(x, fused["w1"], fused["b1"], fused["w2"], fused["b2"],
      fused["w34"], fused["b34"])

    return out


# ---------------------------------------------------------------------------
# Parameter construction (mirrors the PyTorch __init__/reset_noise shapes).
# Weights stored pre-transposed to [in, out]; dense weights in bf16.
# ---------------------------------------------------------------------------
def scale_noise(key, size):
    v = jax.random.normal(key, (size,), dtype=jnp.float32)
    return jnp.sign(v) * jnp.sqrt(jnp.abs(v))


def init_params(key, num_inputs, num_actions, std=0.4):
    ks = jax.random.split(key, 16)
    p = {}

    # nn.Linear(num_inputs, 128)
    r1 = 1.0 / math.sqrt(num_inputs)
    p["w1"] = jax.random.uniform(
        ks[0], (num_inputs, HIDDEN1), jnp.float32, -r1, r1).astype(jnp.bfloat16)
    p["b1"] = jax.random.uniform(ks[1], (1, HIDDEN1), jnp.float32, -r1, r1)

    # nn.Linear(128, 32)
    r2 = 1.0 / math.sqrt(HIDDEN1)
    p["w2"] = jax.random.uniform(
        ks[2], (HIDDEN1, HIDDEN2), jnp.float32, -r2, r2).astype(jnp.bfloat16)
    p["b2"] = jax.random.uniform(ks[3], (1, HIDDEN2), jnp.float32, -r2, r2)

    # NoisyLinear(32, 32), std=0.4
    r3 = 1.0 / math.sqrt(HIDDEN2)
    p["w3_mu"] = jax.random.uniform(ks[4], (HIDDEN2, HIDDEN2), jnp.float32, -r3, r3)
    p["w3_sigma"] = jnp.full((HIDDEN2, HIDDEN2), std / math.sqrt(HIDDEN2), jnp.float32)
    eps_in3 = scale_noise(ks[5], HIDDEN2)
    eps_out3 = scale_noise(ks[6], HIDDEN2)
    p["w3_eps"] = jnp.outer(eps_out3, eps_in3).T          # [out,in] -> [in,out]
    p["b3_mu"] = jax.random.uniform(ks[7], (1, HIDDEN2), jnp.float32, -r3, r3)
    p["b3_sigma"] = jnp.full((1, HIDDEN2), std / math.sqrt(HIDDEN2), jnp.float32)
    # bias_epsilon is an independent _scale_noise(out_f) draw in the module.
    p["b3_eps"] = scale_noise(ks[8], HIDDEN2).reshape(1, HIDDEN2)

    # NoisyLinear(32, num_actions), std=0.4
    r4 = 1.0 / math.sqrt(HIDDEN2)
    p["w4_mu"] = jax.random.uniform(ks[9], (HIDDEN2, num_actions), jnp.float32, -r4, r4)
    p["w4_sigma"] = jnp.full((HIDDEN2, num_actions), std / math.sqrt(HIDDEN2), jnp.float32)
    eps_in4 = scale_noise(ks[10], HIDDEN2)
    eps_out4 = scale_noise(ks[11], num_actions)
    p["w4_eps"] = jnp.outer(eps_out4, eps_in4).T
    p["b4_mu"] = jax.random.uniform(ks[12], (1, num_actions), jnp.float32, -r4, r4)
    # bias_sigma uses out_features in the module's reset_parameters.
    p["b4_sigma"] = jnp.full((1, num_actions), std / math.sqrt(num_actions), jnp.float32)
    p["b4_eps"] = scale_noise(ks[13], num_actions).reshape(1, num_actions)

    return p


def fuse_noisy(p):
    """One-time (per reset_noise) fusion of the two back-to-back NoisyLinear
    layers (no nonlinearity between them in the PyTorch module):
      out = (h2 @ W3 + b3) @ W4 + b4 = h2 @ (W3 @ W4) + (b3 @ W4 + b4)."""
    hi = jax.lax.Precision.HIGHEST
    w3 = p["w3_mu"] + p["w3_sigma"] * p["w3_eps"]
    b3 = p["b3_mu"] + p["b3_sigma"] * p["b3_eps"]
    w4 = p["w4_mu"] + p["w4_sigma"] * p["w4_eps"]
    b4 = p["b4_mu"] + p["b4_sigma"] * p["b4_eps"]
    w34 = jnp.dot(w3, w4, precision=hi)                       # (32, A) f32
    b34 = jnp.dot(b3, w4, precision=hi) + b4                  # (1, A)  f32
    return {
        "w1": p["w1"], "b1": p["b1"],
        "w2": p["w2"], "b2": p["b2"],
        "w34": w34.astype(jnp.bfloat16),   # bf16 MXU operand for the kernel
        "b34": b34,
    }


# ---------------------------------------------------------------------------
# Pure-JAX f32 reference: exactly the un-fused structure of the PyTorch module
# (all matmuls at HIGHEST precision); only the parameter storage dtypes are
# shared with the kernel.
# ---------------------------------------------------------------------------
def reference_forward(x, p):
    hi = jax.lax.Precision.HIGHEST
    x = x.astype(jnp.float32)
    h1 = jnp.maximum(
        jnp.dot(x, p["w1"].astype(jnp.float32), precision=hi) + p["b1"], 0.0)
    h2 = jnp.maximum(
        jnp.dot(h1, p["w2"].astype(jnp.float32), precision=hi) + p["b2"], 0.0)
    w3 = p["w3_mu"] + p["w3_sigma"] * p["w3_eps"]
    b3 = p["b3_mu"] + p["b3_sigma"] * p["b3_eps"]
    w4 = p["w4_mu"] + p["w4_sigma"] * p["w4_eps"]
    b4 = p["b4_mu"] + p["b4_sigma"] * p["b4_eps"]
    h3 = jnp.dot(h2, w3, precision=hi) + b3
    return jnp.dot(h3, w4, precision=hi) + b4


if __name__ == "__main__":
    key = jax.random.PRNGKey(0)
    k_params, k_x1, k_x2 = jax.random.split(key, 3)

    num_inputs = 16
    num_actions = 8

    params = init_params(k_params, num_inputs, num_actions)
    fused = fuse_noisy(params)

    # Small single-tile case (batch=2).
    x1 = jax.random.normal(k_x1, (2, num_inputs), dtype=jnp.float32)
    out1 = jax.block_until_ready(noisy_dqn_forward(x1, fused))
    ref1 = reference_forward(x1, params)
    assert out1.shape == (2, num_actions)
    assert jnp.allclose(out1, ref1, atol=2e-2, rtol=2e-2), (
        f"max abs err (B=2) = {float(jnp.max(jnp.abs(out1 - ref1)))}")

    # Multi-tile case with a ragged last tile (batch=37 -> grid of 2 tiles).
    x2 = jax.random.normal(k_x2, (37, num_inputs), dtype=jnp.float32)
    out2 = jax.block_until_ready(noisy_dqn_forward(x2, fused))
    ref2 = reference_forward(x2, params)
    assert out2.shape == (37, num_actions)
    assert jnp.allclose(out2, ref2, atol=2e-2, rtol=2e-2), (
        f"max abs err (B=37) = {float(jnp.max(jnp.abs(out2 - ref2)))}")

    print("KERNEL_OK")
</pallas_src>

<mosaic_0001>
module attributes {stable_mosaic.version = 11 : i64} {
  func.func @noisy_dqn_kernel(%arg0: i32, %arg1: memref<2x16xf32, #tpu.memory_space<vmem>>, %arg2: memref<16x128xbf16, #tpu.memory_space<vmem>>, %arg3: memref<1x128xf32, #tpu.memory_space<vmem>>, %arg4: memref<128x32xbf16, #tpu.memory_space<vmem>>, %arg5: memref<1x32xf32, #tpu.memory_space<vmem>>, %arg6: memref<32x8xbf16, #tpu.memory_space<vmem>>, %arg7: memref<1x8xf32, #tpu.memory_space<vmem>>, %arg8: memref<2x8xf32, #tpu.memory_space<vmem>>) attributes {dimension_semantics = [#tpu.dimension_semantics<parallel>], iteration_bounds = array<i64: 1>, scalar_prefetch = 0 : i64, scratch_operands = 0 : i64, tpu.core_type = #tpu.core_type<tc>, window_params = [{transform_indices = @transform_0, window_bounds = array<i64: 2, 16>}, {pipeline_mode = #tpu.pipeline_mode<synchronous>, transform_indices = @transform_1, window_bounds = array<i64: 16, 128>}, {pipeline_mode = #tpu.pipeline_mode<synchronous>, transform_indices = @transform_2, window_bounds = array<i64: 1, 128>}, {pipeline_mode = #tpu.pipeline_mode<synchronous>, transform_indices = @transform_3, window_bounds = array<i64: 128, 32>}, {pipeline_mode = #tpu.pipeline_mode<synchronous>, transform_indices = @transform_4, window_bounds = array<i64: 1, 32>}, {pipeline_mode = #tpu.pipeline_mode<synchronous>, transform_indices = @transform_5, window_bounds = array<i64: 32, 8>}, {pipeline_mode = #tpu.pipeline_mode<synchronous>, transform_indices = @transform_6, window_bounds = array<i64: 1, 8>}, {transform_indices = @transform_7, window_bounds = array<i64: 2, 8>}]} {
    %c0 = arith.constant 0 : index
    %c0_0 = arith.constant 0 : index
    %0 = vector.load %arg1[%c0, %c0_0] : memref<2x16xf32, #tpu.memory_space<vmem>>, vector<2x16xf32>
    %1 = arith.truncf %0 : vector<2x16xf32> to vector<2x16xbf16>
    %c0_1 = arith.constant 0 : index
    %c0_2 = arith.constant 0 : index
    %2 = vector.load %arg2[%c0_1, %c0_2] : memref<16x128xbf16, #tpu.memory_space<vmem>>, vector<16x128xbf16>
    %cst = arith.constant dense<0.000000e+00> : vector<2x128xf32>
    %3 = tpu.matmul %1, %2, %cst {dimension_numbers = #tpu.dot_dimension_numbers<[1], [0], [0], [1], [0, 0, 1, 1], [], []>} : vector<2x16xbf16>, vector<16x128xbf16>, vector<2x128xf32> -> vector<2x128xf32>
    %c0_3 = arith.constant 0 : index
    %c0_4 = arith.constant 0 : index
    %4 = vector.load %arg3[%c0_3, %c0_4] : memref<1x128xf32, #tpu.memory_space<vmem>>, vector<1x128xf32>
    %5 = vector.broadcast %4 : vector<1x128xf32> to vector<2x128xf32>
    %6 = arith.addf %3, %5 : vector<2x128xf32>
    %cst_5 = arith.constant 0.000000e+00 : f32
    %7 = vector.broadcast %cst_5 : f32 to vector<2x128xf32>
    %8 = arith.maximumf %6, %7 : vector<2x128xf32>
    %9 = arith.truncf %8 : vector<2x128xf32> to vector<2x128xbf16>
    %c0_6 = arith.constant 0 : index
    %c0_7 = arith.constant 0 : index
    %10 = vector.load %arg4[%c0_6, %c0_7] : memref<128x32xbf16, #tpu.memory_space<vmem>>, vector<128x32xbf16>
    %cst_8 = arith.constant dense<0.000000e+00> : vector<2x32xf32>
    %11 = tpu.matmul %9, %10, %cst_8 {dimension_numbers = #tpu.dot_dimension_numbers<[1], [0], [0], [1], [0, 0, 1, 1], [], []>} : vector<2x128xbf16>, vector<128x32xbf16>, vector<2x32xf32> -> vector<2x32xf32>
    %c0_9 = arith.constant 0 : index
    %c0_10 = arith.constant 0 : index
    %12 = vector.load %arg5[%c0_9, %c0_10] : memref<1x32xf32, #tpu.memory_space<vmem>>, vector<1x32xf32>
    %13 = vector.broadcast %12 : vector<1x32xf32> to vector<2x32xf32>
    %14 = arith.addf %11, %13 : vector<2x32xf32>
    %cst_11 = arith.constant 0.000000e+00 : f32
    %15 = vector.broadcast %cst_11 : f32 to vector<2x32xf32>
    %16 = arith.maximumf %14, %15 : vector<2x32xf32>
    %17 = arith.truncf %16 : vector<2x32xf32> to vector<2x32xbf16>
    %c0_12 = arith.constant 0 : index
    %c0_13 = arith.constant 0 : index
    %18 = vector.load %arg6[%c0_12, %c0_13] : memref<32x8xbf16, #tpu.memory_space<vmem>>, vector<32x8xbf16>
    %cst_14 = arith.constant dense<0.000000e+00> : vector<2x8xf32>
    %19 = tpu.matmul %17, %18, %cst_14 {dimension_numbers = #tpu.dot_dimension_numbers<[1], [0], [0], [1], [0, 0, 1, 1], [], []>} : vector<2x32xbf16>, vector<32x8xbf16>, vector<2x8xf32> -> vector<2x8xf32>
    %c0_15 = arith.constant 0 : index
    %c0_16 = arith.constant 0 : index
    %20 = vector.load %arg7[%c0_15, %c0_16] : memref<1x8xf32, #tpu.memory_space<vmem>>, vector<1x8xf32>
    %21 = vector.broadcast %20 : vector<1x8xf32> to vector<2x8xf32>
    %22 = arith.addf %19, %21 : vector<2x8xf32>
    %c0_17 = arith.constant 0 : index
    %c0_18 = arith.constant 0 : index
    %23 = vector.load %arg8[%c0_17, %c0_18] : memref<2x8xf32, #tpu.memory_space<vmem>>, vector<2x8xf32>
    tpu.vector_store %arg8[%c0_17, %c0_18], %22 {strides = array<i32>} : memref<2x8xf32, #tpu.memory_space<vmem>>, vector<2x8xf32>,
    return
  }
  func.func @transform_0(%arg0: i32) -> (i32, i32) {
    %c0_i32 = arith.constant 0 : i32
    %c0_i32_0 = arith.constant 0 : i32
    return %arg0, %c0_i32 : i32, i32
  }
  func.func @transform_1(%arg0: i32) -> (i32, i32) {
    %c0_i32 = arith.constant 0 : i32
    %c0_i32_0 = arith.constant 0 : i32
    %c0_i32_1 = arith.constant 0 : i32
    return %c0_i32, %c0_i32_0 : i32, i32
  }
  func.func @transform_2(%arg0: i32) -> (i32, i32) {
    %c0_i32 = arith.constant 0 : i32
    %c0_i32_0 = arith.constant 0 : i32
    %c0_i32_1 = arith.constant 0 : i32
    return %c0_i32, %c0_i32_0 : i32, i32
  }
  func.func @transform_3(%arg0: i32) -> (i32, i32) {
    %c0_i32 = arith.constant 0 : i32
    %c0_i32_0 = arith.constant 0 : i32
    %c0_i32_1 = arith.constant 0 : i32
    return %c0_i32, %c0_i32_0 : i32, i32
  }
  func.func @transform_4(%arg0: i32) -> (i32, i32) {
    %c0_i32 = arith.constant 0 : i32
    %c0_i32_0 = arith.constant 0 : i32
    %c0_i32_1 = arith.constant 0 : i32
    return %c0_i32, %c0_i32_0 : i32, i32
  }
  func.func @transform_5(%arg0: i32) -> (i32, i32) {
    %c0_i32 = arith.constant 0 : i32
    %c0_i32_0 = arith.constant 0 : i32
    %c0_i32_1 = arith.constant 0 : i32
    return %c0_i32, %c0_i32_0 : i32, i32
  }
  func.func @transform_6(%arg0: i32) -> (i32, i32) {
    %c0_i32 = arith.constant 0 : i32
    %c0_i32_0 = arith.constant 0 : i32
    %c0_i32_1 = arith.constant 0 : i32
    return %c0_i32, %c0_i32_0 : i32, i32
  }
  func.func @transform_7(%arg0: i32) -> (i32, i32) {
    %c0_i32 = arith.constant 0 : i32
    %c0_i32_0 = arith.constant 0 : i32
    return %arg0, %c0_i32 : i32, i32
  }
}

</mosaic_0001>

<bundles_post_ra>
// kernel: tpu_custom_call.1
= control target key start
LH: loop header
LB: loop body
LE: loop exit
PB: predicated region body
PF: predicated region fallthrough
CT: control target
= control target key end

     0   :  { %v389_v1 = vmov 0.0   ;;  %vm390_vm0 = vmmov 0   ;;  %vm45_vm1 = vcmask 130048   ;;  %s489_s0 = inlined_call_operand.vmem [shape: f32[2,16], index: 0, kind: input, shape index: {}]   ;;  %s490_s1 = inlined_call_operand.vmem [shape: bf16[16,128], index: 1, kind: input, shape index: {}]   ;;  %s491_s2 = inlined_call_operand.vmem [shape: f32[1,128], index: 2, kind: input, shape index: {}]   ;;  %s492_s3 = inlined_call_operand.vmem [shape: bf16[128,32], index: 3, kind: input, shape index: {}]   ;;  %s493_s4 = inlined_call_operand.vmem [shape: f32[1,32], index: 4, kind: input, shape index: {}]   ;;  %s494_s5 = inlined_call_operand.vmem [shape: bf16[32,8], index: 5, kind: input, shape index: {}]   ;;  %s495_s6 = inlined_call_operand.vmem [shape: f32[1,8], index: 6, kind: input, shape index: {}]   ;;  %s496_s7 = inlined_call_operand.hbm [shape: f32[2,8], index: 7, kind: output, shape index: {}]  }
   0x1   :  { %v354_v0 = vld [vmem:[%s490_s1] sm:$0xff]   ;;  %317 = vmatprep.subr.bf16.mxu0 %v389_v1  ;;  %323 = vmatprep.subr.bf16.mxu1 %v389_v1  ;;  %v356_v5 = vld [vmem:[%s492_s3 + $0x8] sm:$0xff]   ;;  %v357_v6 = vld [vmem:[%s492_s3 + $0x10] sm:$0xff]  }
   0x2   :  { %v28_v2 = vld [vmem:[%s489_s0] sm:$0x3]  ;;  %318 = vmatpush3.bf16.msra.mxu0 %v354_v0  ;;  %319 = vmatprep.mubr.msk.bf16.mxu0 %vm390_vm0, %v389_v1 }
   0x3   :  { %v29_v3 = vpack.c.bf16 %v28_v2, %v28_v2  ;;  %v355_v4 = vld [vmem:[%s492_s3] sm:$0xff]   ;;  %339 = vmatprep.mubr.msk.bf16.mxu1 %vm390_vm0, %v389_v1  ;;  %343 = vmatprep.subr.bf16.mxu0 %v389_v1 }
   0x4   :  { %324 = vmatpush3.bf16.msra.mxu1 %v355_v4 }
   0x5   :  { %320 = vmatmul.mubr.msk.bf16.vlgmr.msra.gmra.mrb[0].mxu0 %vm45_vm1, %v29_v3  ;;  %325 = vmatprep.subr.bf16.mxu1 %v389_v1 }
   0x6   :  { %347 = vmatprep.mubr.msk.bf16.mxu0 %vm390_vm0, %v389_v1 }
   0x8   :  { %326 = vmatpush3.bf16.msra.mxu1 %v356_v5 }
   0x9   :  { %327 = vmatprep.subr.bf16.mxu1 %v389_v1 }
   0xa   :  { %12 = vsyncpa [#allocation3], 0  ;;  %v358_v7 = vld [vmem:[%s492_s3 + $0x18] sm:$0xff]   ;;  %v359_v8 = vld [vmem:[%s492_s3 + $0x20] sm:$0xff]   ;;  %vm227_vm2 = vcmask 261120   ;;  %s391_s27 = smov [#allocation2]  }
   0xb   :  { %v360_v9 = vld [vmem:[%s492_s3 + $0x28] sm:$0xff]   ;;  %v361_v10 = vld [vmem:[%s492_s3 + $0x30] sm:$0xff]   ;;  %v362_v11 = vld [vmem:[%s492_s3 + $0x38] sm:$0xff]   ;;  %vm271_vm3 = vcmask 58368  }
   0xc   :  { %328 = vmatpush3.bf16.msra.mxu1 %v357_v6  ;;  %v363_v12 = vld [vmem:[%s494_s5] sm:$0xff]   ;;  %v364_v21 = vld [vmem:[%s494_s5 + $0x8] sm:$0xff]   ;;  %s279_s5 = sshll.u32 %s391_s27, 4  ;;  %s280_s5 = int_to_ptr.vmem [resolvable:$true] %s279_s5 }
   0xd   :  { %329 = vmatprep.subr.bf16.mxu1 %v389_v1  ;;  %344 = vmatpush3.bf16.msra.mxu0 %v363_v12  ;;  %v287_v13 = vld [vmem:[%s491_s2] ss:$0 sm:$0xff]  ;;  %p370_p1 = scmp.lt.s32.totalorder %s280_s5, %s280_s5 }
   0xe   :  { %345 = vmatprep.subr.bf16.mxu0 %v389_v1  ;;  %v290_v22 = vld [vmem:[%s493_s4] ss:$0 sm:$0xff]  ;;  %s365_s4 = scalar_lea.vmem %s280_s5, 32 }
   0xf   :  { %v299_v30 = vld [vmem:[%s495_s6] ss:$0 sm:$0xff]  ;;  %p366_p0 = scmp.ne.s32.totalorder %s280_s5, %s365_s4  ;;  %p371_p2 = scmp.lt.s32.totalorder %s365_s4, %s365_s4 }
  0x10   :  { %330 = vmatpush3.bf16.msra.mxu1 %v358_v7 }
  0x11   :  { %331 = vmatprep.subr.bf16.mxu1 %v389_v1  ;;  %346 = vmatpush3.bf16.msra.mxu0 %v364_v21  ;;  %p372_p3 = por %p371_p2, %p370_p1 }
  0x13   :  { %p373_p4 = pnand %p372_p3, %p366_p0 }
  0x14   :  { %332 = vmatpush3.bf16.msra.mxu1 %v359_v8 }
  0x15   :  { %333 = vmatprep.subr.bf16.mxu1 %v389_v1 }
  0x18   :  { %334 = vmatpush3.bf16.msra.mxu1 %v360_v9 }
  0x19   :  { %335 = vmatprep.subr.bf16.mxu1 %v389_v1 }
  0x1c   :  { %336 = vmatpush3.bf16.msra.mxu1 %v361_v10 }
  0x1d   :  { %337 = vmatprep.subr.bf16.mxu1 %v389_v1 }
  0x20   :  { %338 = vmatpush3.bf16.msra.mxu1 %v362_v11 }
  0xd8   :  { %v83_v14 = vpop.f32.mrb[0].mxu0 }
  0xd9   :  { %v84_v15 = vadd.f32 %v287_v13, %v83_v14  ;;  %v321_v16 = vpop.f32.mrb[1].mxu0 }
  0xda   :  { %v86_v17 = vpop.f32.mrb[2].mxu0 }
  0xdb   :  { %v89_v18 = vmax.f32 %v84_v15, 0.0  ;;  %v322_v19 = vpop.f32.mrb[3].mxu0 }
  0xdd   :  { %v90_v20 = vpack.c.bf16 %v89_v18, %v89_v18 }
  0xdf   :  { %340 = vmatmul.mubr.bf16.vlgmr.msra.gmra.mrb[0].mxu1 %v90_v20 }
 0x1b2   :  { %v196_v23 = vpop.f32.mrb[0].mxu1 }
 0x1b3   :  { %v197_v24 = vadd.f32 %v290_v22, %v196_v23  ;;  %v341_v25 = vpop.f32.mrb[1].mxu1 }
 0x1b4   :  { %v199_v26 = vpop.f32.mrb[2].mxu1 }
 0x1b5   :  { %v202_v27 = vmax.f32 %v197_v24, 0.0  ;;  %v342_v28 = vpop.f32.mrb[3].mxu1 }
 0x1b7   :  { %v203_v29 = vpack.c.bf16 %v202_v27, %v202_v27 }
 0x1b9   :  { %348 = vmatmul.mubr.msk.bf16.vlgmr.msra.gmra.mrb[4].mxu0 %vm227_vm2, %v203_v29 }
 0x28c   :  { %v265_v31 = vpop.f32.mrb[4].mxu0 }
 0x28d   :  { %v266_v32 = vadd.f32 %v299_v30, %v265_v31  ;;  %v349_v33 = vpop.f32.mrb[5].mxu0 }
 0x28e   :  { %v268_v34 = vpop.f32.mrb[6].mxu0 }
 0x28f   :  { %v350_v35 = vpop.f32.mrb[7].mxu0  ;;  %272 = vst.msk [vmem:[#allocation2] sm:$0x3] %vm271_vm3, %v266_v32 }
 0x290   :  { %376 = shalt.err (!%p373_p4)
}
 0x291   :  { %s377_s6 = scalar_lea.hbm %s496_s7, 32 }
 0x292   :  { %p378_p5 = scmp.ne.s32.totalorder %s496_s7, %s377_s6  ;;  %p381_p6 = scmp.lt.u32.totalorder %s377_s6, %s496_s7 }
 0x294   :  { %p383_p7 = pnand %p381_p6, %p378_p5 }
 0x296   :  { %386 = shalt.err (!%p383_p7)
}
 0x297   :  { %282 = dma.vmem_to_hbm [thread:$0]  %s280_s5, 32, %s496_s7, [#allocation3]  }
 0x298   :  { %387 = dma.done.wait [#allocation3], 32  }
 0x299   :  { %388 = vsyncadd [#allocation3], 4294967264 }
 0x29a   :  { %286 = vsyncpa [#allocation3], 1 }

</bundles_post_ra>
